<compile_context>
chip_gen: v5e
topology: v5e:2x2
jax: 0.10.0
libtpu: 0.0.40
codegen_flags: <defaults>
</compile_context>

<pallas_src>
import jax
import jax.numpy as jnp
from jax import lax
from jax.experimental import pallas as pl
from jax.experimental.pallas import tpu as pltpu


def _cdiv(a, b):
    return -(-a // b)


def _vmem_limit_bytes():
    cap = 64 * 1024 * 1024  # conservative fallback (v7x physical VMEM per TC)
    try:
        cap = int(pltpu.get_tpu_info().vmem_capacity_bytes)
    except Exception:
        pass
    # v5e/v6e (128 MiB) -> 96 MiB limit, v7x (64 MiB) -> 48 MiB limit.
    return int(min(cap * 3 // 4, 96 * 1024 * 1024))


def attention_pooling(features, attention_mask, w_weight, w_bias, v_weight,
                      v_bias, *, operand_dtype=jnp.bfloat16,
                      max_rows_per_step=8):
    """Pallas TPU forward of AttentionPooling.

    features: [B, S, F] (any float dtype; streamed as-is, cast per tile);
    attention_mask: [B, S] 0/1 (assumed prefix padding mask); w_weight: [H, F];
    w_bias: [H]; v_weight: [1, H]; v_bias: [1] (PyTorch Linear layouts).
    Returns context_vector [B, F] float32.
    """
    feat = jnp.asarray(features)
    B, S, F = feat.shape
    H = w_weight.shape[0]
    in_dtype = feat.dtype

    # ---- batch blocking ------------------------------------------------------
    bt = max(1, min(max_rows_per_step, B))
    if B > 1 and _cdiv(B, bt) < 2:
        bt = _cdiv(B, 2)            # >= 2 batch blocks: keep both v7x TCs busy
    n_bblk = _cdiv(B, bt)

    # ---- generation-aware VMEM budget & seq tile -----------------------------
    vmem_limit = _vmem_limit_bytes()
    op_itemsize = jnp.dtype(operand_dtype).itemsize
    in_itemsize = jnp.dtype(in_dtype).itemsize
    w_bytes = 2 * F * H * op_itemsize                  # resident W^T (buffered)
    tile_cap = max(256 * 1024, (vmem_limit - w_bytes) // 6)
    ts = max(16, tile_cap // max(1, bt * F * in_itemsize) // 16 * 16)
    if ts >= S:
        ts = S                                         # single seq tile (full dim)
    else:
        for cand in range(ts, max(15, ts // 2 - 1), -16):
            if S % cand == 0:                          # prefer no ragged tail
                ts = cand
                break
    n_sblk = _cdiv(S, ts)
    s_tail = (S % ts) != 0

    # ---- small operands (no pass over the feature tensor) --------------------
    # TODO(synk): non-prefix (non-contiguous) attention masks would need a
    # lane-dense [B, S] mask block instead of per-row lengths.
    lengths = jnp.sum(jnp.asarray(attention_mask) != 0, axis=1).astype(jnp.int32)
    if n_bblk * bt != B:
        lengths = jnp.pad(lengths, (0, n_bblk * bt - B))

    wt = jnp.asarray(w_weight, jnp.float32).T.astype(operand_dtype)      # [F, H]
    wb = jnp.asarray(w_bias, jnp.float32).reshape(1, H)                  # [1, H]
    v = jnp.asarray(v_weight, jnp.float32).reshape(1, H)                 # [1, H]
    vb = jnp.asarray(v_bias, jnp.float32).reshape(1, 1)                  # [1, 1]
    # Static softmax shift: |score| <= ||v||_1 + |b_V| (tanh in [-1, 1]), so
    # exp(score - smax) <= 1 and no online running max is needed.
    # TODO(synk): pathologically large ||v||_1 (> ~40) could underflow every
    # valid probability to 0; such weights would need the online-max variant.
    smax = jnp.sum(jnp.abs(v)) + jnp.abs(vb[0, 0])
    vbs = vb - smax                                                      # [1, 1]

    out_2d = (bt % 8 == 0) or (bt == B)

    def kernel(lens_ref, feat_ref, wt_ref, wb_ref, v_ref, vbs_ref, out_ref,
               l_sc, acc_sc):
        bi = pl.program_id(0)
        si = pl.program_id(1)

        @pl.when(si == 0)
        def _init():
            l_sc[...] = jnp.zeros(l_sc.shape, l_sc.dtype)
            acc_sc[...] = jnp.zeros(acc_sc.shape, acc_sc.dtype)

        # Merged projection for all bt rows: one MXU dot, one bias-add, one tanh.
        x = feat_ref[...].reshape(bt * ts, F).astype(operand_dtype)
        att = jnp.tanh(
            jnp.dot(x, wt_ref[...], preferred_element_type=jnp.float32)
            + wb_ref[...])                                      # [bt*ts, H] f32
        # V projection once on the merged tile (VPU mul + XLU lane reduce);
        # the static softmax shift is pre-folded into the bias.
        score = jnp.sum(att * v_ref[...], axis=-1, keepdims=True) + vbs_ref[...]

        tok = si * ts + lax.broadcasted_iota(jnp.int32, (ts, 1), 0)      # [ts, 1]
        if s_tail:
            in_bounds = tok < S          # ragged last seq tile reads OOB rows

        for i in range(bt):              # static unroll over the batch rows
            n_valid = lens_ref[bi * bt + i]
            s_i = score[i * ts:(i + 1) * ts]                             # [ts, 1]
            # Masked tokens (and any garbage/NaN score) get weight exactly 0.
            p = jnp.where(tok < n_valid, jnp.exp(s_i), 0.0)              # [ts, 1]
            l_sc[pl.ds(i, 1), :] += jnp.sum(p, axis=0, keepdims=True)

            x_i = x[i * ts:(i + 1) * ts]                                 # [ts, F]
            if s_tail:
                x_i = jnp.where(in_bounds, x_i, jnp.zeros_like(x_i))
            # Context accumulation p^T @ x on the MXU with f32 accumulation.
            acc_sc[pl.ds(i, 1), :] += lax.dot_general(
                p.astype(x_i.dtype), x_i, (((0,), (0,)), ((), ())),
                preferred_element_type=jnp.float32)

        @pl.when(si == pl.num_programs(1) - 1)
        def _finalize():
            res = (acc_sc[...] / l_sc[...]).astype(out_ref.dtype)  # exact divide
            out_ref[...] = res.reshape(out_ref.shape)

    if out_2d:
        out_shape = jax.ShapeDtypeStruct((B, F), jnp.float32)
        out_spec = pl.BlockSpec((bt, F), lambda bi, si, lens: (bi, 0))
    else:
        # bt not a sublane multiple: keep the (always-legal) size-1 middle dim.
        out_shape = jax.ShapeDtypeStruct((B, 1, F), jnp.float32)
        out_spec = pl.BlockSpec((bt, 1, F), lambda bi, si, lens: (bi, 0, 0))

    out = pl.pallas_call(
        kernel,
        out_shape=out_shape,
        grid_spec=pltpu.PrefetchScalarGridSpec(
            num_scalar_prefetch=1,                      # lengths -> SMEM
            grid=(n_bblk, n_sblk),
            in_specs=[
                pl.BlockSpec((bt, ts, F), lambda bi, si, lens: (bi, si, 0)),
                pl.BlockSpec((F, H), lambda bi, si, lens: (0, 0)),
                pl.BlockSpec((1, H), lambda bi, si, lens: (0, 0)),
                pl.BlockSpec((1, H), lambda bi, si, lens: (0, 0)),
                pl.BlockSpec((1, 1), lambda bi, si, lens: (0, 0)),
            ],
            out_specs=out_spec,
            scratch_shapes=[
                pltpu.VMEM((bt, 1), jnp.float32),       # running softmax denom
                pltpu.VMEM((bt, F), jnp.float32),       # running context sum
            ],
        ),
        compiler_params=pltpu.CompilerParams(
            dimension_semantics=("parallel", "arbitrary"),
            vmem_limit_bytes=vmem_limit,
        ),
    )(lengths, feat, wt, wb, v, vbs)

    return out if out_2d else out[:, 0, :]


def _reference(features, attention_mask, w_weight, w_bias, v_weight, v_bias):
    # Pure-JAX mirror of the PyTorch forward (for correctness check).
    att = jnp.tanh(jnp.einsum("bsf,hf->bsh", features, w_weight) + w_bias)
    score = jnp.einsum("bsh,oh->bso", att, v_weight) + v_bias            # [B,S,1]
    score = jnp.where(attention_mask[..., None] == 0, -jnp.inf, score)
    attn = jax.nn.softmax(score, axis=1)
    return jnp.sum(attn * attention_mask[..., None] * features, axis=1)


if __name__ == "__main__":
    # Small shapes consistent with the module: batch=2, seq=8, in_features=32, hidden=32
    B, S, F, H = 2, 8, 32, 32
    key = jax.random.PRNGKey(0)
    k_feat, k_w, k_wb, k_v, k_vb = jax.random.split(key, 5)

    features = jax.random.normal(k_feat, (B, S, F), dtype=jnp.float32)
    # Mask: first batch row has 6 valid tokens, second has 8 (all valid).
    lengths = jnp.array([6, 8], dtype=jnp.int32)
    attention_mask = (jnp.arange(S)[None, :] < lengths[:, None]).astype(jnp.float32)

    bound_w = 1.0 / (F ** 0.5)
    bound_v = 1.0 / (H ** 0.5)
    w_weight = jax.random.uniform(k_w, (H, F), jnp.float32, -bound_w, bound_w)
    w_bias = jax.random.uniform(k_wb, (H,), jnp.float32, -bound_w, bound_w)
    v_weight = jax.random.uniform(k_v, (1, H), jnp.float32, -bound_v, bound_v)
    v_bias = jax.random.uniform(k_vb, (1,), jnp.float32, -bound_v, bound_v)

    ref = _reference(features, attention_mask, w_weight, w_bias, v_weight, v_bias)

    # f32 operand path: tight check against the f32 reference.
    out_f32 = attention_pooling(features, attention_mask, w_weight, w_bias,
                                v_weight, v_bias, operand_dtype=jnp.float32)
    out_f32 = jax.block_until_ready(out_f32)
    assert out_f32.shape == (B, F)
    assert jnp.allclose(out_f32, ref, atol=1e-4, rtol=1e-4), "f32 mismatch vs reference"

    # Default bf16 MXU-operand path (f32 accumulation / softmax math).
    out_bf16 = attention_pooling(features, attention_mask, w_weight, w_bias,
                                 v_weight, v_bias)
    out_bf16 = jax.block_until_ready(out_bf16)
    assert out_bf16.shape == (B, F)
    assert jnp.allclose(out_bf16, ref, atol=5e-2, rtol=5e-2), "bf16 mismatch vs reference"

    print("KERNEL_OK")
</pallas_src>

<mosaic_0001>
module attributes {stable_mosaic.version = 11 : i64} {
  func.func @kernel(%arg0: i32, %arg1: i32, %arg2: memref<2xi32, #tpu.memory_space<smem>>, %arg3: memref<1x8x32xf32, #tpu.memory_space<vmem>>, %arg4: memref<32x32xf32, #tpu.memory_space<vmem>>, %arg5: memref<1x32xf32, #tpu.memory_space<vmem>>, %arg6: memref<1x32xf32, #tpu.memory_space<vmem>>, %arg7: memref<1x1xf32, #tpu.memory_space<vmem>>, %arg8: memref<1x1x32xf32, #tpu.memory_space<vmem>>, %arg9: memref<1x1xf32, #tpu.memory_space<vmem>>, %arg10: memref<1x32xf32, #tpu.memory_space<vmem>>) attributes {dimension_semantics = [#tpu.dimension_semantics<parallel>, #tpu.dimension_semantics<arbitrary>], iteration_bounds = array<i64: 2, 1>, scalar_prefetch = 1 : i64, scratch_operands = 2 : i64, tpu.core_type = #tpu.core_type<tc>, window_params = [{transform_indices = @transform_0, window_bounds = array<i64: 1, 8, 32>}, {pipeline_mode = #tpu.pipeline_mode<synchronous>, transform_indices = @transform_1, window_bounds = array<i64: 32, 32>}, {pipeline_mode = #tpu.pipeline_mode<synchronous>, transform_indices = @transform_2, window_bounds = array<i64: 1, 32>}, {pipeline_mode = #tpu.pipeline_mode<synchronous>, transform_indices = @transform_3, window_bounds = array<i64: 1, 32>}, {pipeline_mode = #tpu.pipeline_mode<synchronous>, transform_indices = @transform_4, window_bounds = array<i64: 1, 1>}, {transform_indices = @transform_5, window_bounds = array<i64: 1, 1, 32>}]} {
    %c0_i32 = arith.constant 0 : i32
    %0 = arith.cmpi eq, %arg1, %c0_i32 : i32
    %1 = arith.extui %0 : i1 to i32
    %c0_i32_0 = arith.constant 0 : i32
    %2 = arith.cmpi ne, %1, %c0_i32_0 : i32
    scf.if %2 {
      %cst_26 = arith.constant 0.000000e+00 : f32
      %44 = vector.broadcast %cst_26 : f32 to vector<1x1xf32>
      %c0_27 = arith.constant 0 : index
      %c0_28 = arith.constant 0 : index
      %45 = vector.load %arg9[%c0_27, %c0_28] : memref<1x1xf32, #tpu.memory_space<vmem>>, vector<1x1xf32>
      tpu.vector_store %arg9[%c0_27, %c0_28], %44 {strides = array<i32>} : memref<1x1xf32, #tpu.memory_space<vmem>>, vector<1x1xf32>,
      %cst_29 = arith.constant 0.000000e+00 : f32
      %46 = vector.broadcast %cst_29 : f32 to vector<1x32xf32>
      %c0_30 = arith.constant 0 : index
      %c0_31 = arith.constant 0 : index
      %47 = vector.load %arg10[%c0_30, %c0_31] : memref<1x32xf32, #tpu.memory_space<vmem>>, vector<1x32xf32>
      tpu.vector_store %arg10[%c0_30, %c0_31], %46 {strides = array<i32>} : memref<1x32xf32, #tpu.memory_space<vmem>>, vector<1x32xf32>,
    } else {
    }
    %c0 = arith.constant 0 : index
    %c0_1 = arith.constant 0 : index
    %c0_2 = arith.constant 0 : index
    %3 = vector.load %arg3[%c0, %c0_1, %c0_2] : memref<1x8x32xf32, #tpu.memory_space<vmem>>, vector<1x8x32xf32>
    %4 = vector.shape_cast %3 : vector<1x8x32xf32> to vector<8x32xf32>
    %c0_3 = arith.constant 0 : index
    %c0_4 = arith.constant 0 : index
    %5 = vector.load %arg4[%c0_3, %c0_4] : memref<32x32xf32, #tpu.memory_space<vmem>>, vector<32x32xf32>
    %cst = arith.constant dense<0.000000e+00> : vector<8x32xf32>
    %6 = tpu.matmul %4, %5, %cst {dimension_numbers = #tpu.dot_dimension_numbers<[1], [0], [0], [1], [0, 0, 1, 1], [], []>} : vector<8x32xf32>, vector<32x32xf32>, vector<8x32xf32> -> vector<8x32xf32>
    %c0_5 = arith.constant 0 : index
    %c0_6 = arith.constant 0 : index
    %7 = vector.load %arg5[%c0_5, %c0_6] : memref<1x32xf32, #tpu.memory_space<vmem>>, vector<1x32xf32>
    %8 = vector.broadcast %7 : vector<1x32xf32> to vector<8x32xf32>
    %9 = arith.addf %6, %8 : vector<8x32xf32>
    %10 = math.tanh %9 : vector<8x32xf32>
    %c0_7 = arith.constant 0 : index
    %c0_8 = arith.constant 0 : index
    %11 = vector.load %arg6[%c0_7, %c0_8] : memref<1x32xf32, #tpu.memory_space<vmem>>, vector<1x32xf32>
    %12 = vector.broadcast %11 : vector<1x32xf32> to vector<8x32xf32>
    %13 = arith.mulf %10, %12 : vector<8x32xf32>
    %cst_9 = arith.constant dense<0.000000e+00> : vector<8xf32>
    %14 = vector.multi_reduction <add>, %13, %cst_9 [1] : vector<8x32xf32> to vector<8xf32>
    %15 = vector.shape_cast %14 : vector<8xf32> to vector<8x1xf32>
    %c0_10 = arith.constant 0 : index
    %c0_11 = arith.constant 0 : index
    %16 = vector.load %arg7[%c0_10, %c0_11] : memref<1x1xf32, #tpu.memory_space<vmem>>, vector<1x1xf32>
    %17 = vector.broadcast %16 : vector<1x1xf32> to vector<8x1xf32>
    %18 = arith.addf %15, %17 : vector<8x1xf32>
    %c8_i32 = arith.constant 8 : i32
    %19 = arith.muli %arg1, %c8_i32 : i32
    %20 = tpu.iota {dimensions = array<i32: 0>} : vector<8x1xi32>
    %21 = vector.broadcast %19 : i32 to vector<8x1xi32>
    %22 = arith.addi %21, %20 : vector<8x1xi32>
    %c1_i32 = arith.constant 1 : i32
    %23 = arith.muli %arg0, %c1_i32 : i32
    %c0_i32_12 = arith.constant 0 : i32
    %24 = arith.addi %23, %c0_i32_12 : i32
    %25 = arith.index_cast %24 : i32 to index
    %26 = memref.load %arg2[%25] : memref<2xi32, #tpu.memory_space<smem>>
    %27 = vector.broadcast %26 : i32 to vector<8x1xi32>
    %28 = arith.cmpi slt, %22, %27 : vector<8x1xi32>
    %29 = math.exp %18 : vector<8x1xf32>
    %cst_13 = arith.constant 0.000000e+00 : f32
    %30 = vector.broadcast %cst_13 : f32 to vector<8x1xf32>
    %31 = arith.select %28, %29, %30 : vector<8x1xi1>, vector<8x1xf32>
    %c0_14 = arith.constant 0 : index
    %c0_15 = arith.constant 0 : index
    %32 = vector.load %arg9[%c0_14, %c0_15] : memref<1x1xf32, #tpu.memory_space<vmem>>, vector<1x1xf32>
    %cst_16 = arith.constant dense<0.000000e+00> : vector<1xf32>
    %33 = vector.multi_reduction <add>, %31, %cst_16 [0] : vector<8x1xf32> to vector<1xf32>
    %34 = vector.shape_cast %33 : vector<1xf32> to vector<1x1xf32>
    %35 = arith.addf %32, %34 : vector<1x1xf32>
    %c0_17 = arith.constant 0 : index
    %c0_18 = arith.constant 0 : index
    %36 = vector.load %arg9[%c0_17, %c0_18] : memref<1x1xf32, #tpu.memory_space<vmem>>, vector<1x1xf32>
    tpu.vector_store %arg9[%c0_17, %c0_18], %35 {strides = array<i32>} : memref<1x1xf32, #tpu.memory_space<vmem>>, vector<1x1xf32>,
    %c0_19 = arith.constant 0 : index
    %c0_20 = arith.constant 0 : index
    %37 = vector.load %arg10[%c0_19, %c0_20] : memref<1x32xf32, #tpu.memory_space<vmem>>, vector<1x32xf32>
    %cst_21 = arith.constant dense<0.000000e+00> : vector<1x32xf32>
    %38 = tpu.matmul %31, %4, %cst_21 {dimension_numbers = #tpu.dot_dimension_numbers<[0], [0], [1], [1], [0, 1, 1, 1], [], []>} : vector<8x1xf32>, vector<8x32xf32>, vector<1x32xf32> -> vector<1x32xf32>
    %39 = arith.addf %37, %38 : vector<1x32xf32>
    %c0_22 = arith.constant 0 : index
    %c0_23 = arith.constant 0 : index
    %40 = vector.load %arg10[%c0_22, %c0_23] : memref<1x32xf32, #tpu.memory_space<vmem>>, vector<1x32xf32>
    tpu.vector_store %arg10[%c0_22, %c0_23], %39 {strides = array<i32>} : memref<1x32xf32, #tpu.memory_space<vmem>>, vector<1x32xf32>,
    %c0_i32_24 = arith.constant 0 : i32
    %41 = arith.cmpi eq, %arg1, %c0_i32_24 : i32
    %42 = arith.extui %41 : i1 to i32
    %c0_i32_25 = arith.constant 0 : i32
    %43 = arith.cmpi ne, %42, %c0_i32_25 : i32
    scf.if %43 {
      %c0_26 = arith.constant 0 : index
      %c0_27 = arith.constant 0 : index
      %44 = vector.load %arg10[%c0_26, %c0_27] : memref<1x32xf32, #tpu.memory_space<vmem>>, vector<1x32xf32>
      %c0_28 = arith.constant 0 : index
      %c0_29 = arith.constant 0 : index
      %45 = vector.load %arg9[%c0_28, %c0_29] : memref<1x1xf32, #tpu.memory_space<vmem>>, vector<1x1xf32>
      %46 = vector.broadcast %45 : vector<1x1xf32> to vector<1x32xf32>
      %47 = arith.divf %44, %46 : vector<1x32xf32>
      %48 = vector.shape_cast %47 : vector<1x32xf32> to vector<1x1x32xf32>
      %c0_30 = arith.constant 0 : index
      %c0_31 = arith.constant 0 : index
      %c0_32 = arith.constant 0 : index
      %49 = vector.load %arg8[%c0_30, %c0_31, %c0_32] : memref<1x1x32xf32, #tpu.memory_space<vmem>>, vector<1x1x32xf32>
      tpu.vector_store %arg8[%c0_30, %c0_31, %c0_32], %48 {strides = array<i32>} : memref<1x1x32xf32, #tpu.memory_space<vmem>>, vector<1x1x32xf32>,
    } else {
    }
    return
  }
  func.func @transform_0(%arg0: i32, %arg1: i32, %arg2: memref<2xi32, #tpu.memory_space<smem>>) -> (i32, i32, i32) {
    %c0_i32 = arith.constant 0 : i32
    %c0_i32_0 = arith.constant 0 : i32
    return %arg0, %arg1, %c0_i32 : i32, i32, i32
  }
  func.func @transform_1(%arg0: i32, %arg1: i32, %arg2: memref<2xi32, #tpu.memory_space<smem>>) -> (i32, i32) {
    %c0_i32 = arith.constant 0 : i32
    %c0_i32_0 = arith.constant 0 : i32
    %c0_i32_1 = arith.constant 0 : i32
    return %c0_i32, %c0_i32_0 : i32, i32
  }
  func.func @transform_2(%arg0: i32, %arg1: i32, %arg2: memref<2xi32, #tpu.memory_space<smem>>) -> (i32, i32) {
    %c0_i32 = arith.constant 0 : i32
    %c0_i32_0 = arith.constant 0 : i32
    %c0_i32_1 = arith.constant 0 : i32
    return %c0_i32, %c0_i32_0 : i32, i32
  }
  func.func @transform_3(%arg0: i32, %arg1: i32, %arg2: memref<2xi32, #tpu.memory_space<smem>>) -> (i32, i32) {
    %c0_i32 = arith.constant 0 : i32
    %c0_i32_0 = arith.constant 0 : i32
    %c0_i32_1 = arith.constant 0 : i32
    return %c0_i32, %c0_i32_0 : i32, i32
  }
  func.func @transform_4(%arg0: i32, %arg1: i32, %arg2: memref<2xi32, #tpu.memory_space<smem>>) -> (i32, i32) {
    %c0_i32 = arith.constant 0 : i32
    %c0_i32_0 = arith.constant 0 : i32
    %c0_i32_1 = arith.constant 0 : i32
    return %c0_i32, %c0_i32_0 : i32, i32
  }
  func.func @transform_5(%arg0: i32, %arg1: i32, %arg2: memref<2xi32, #tpu.memory_space<smem>>) -> (i32, i32, i32) {
    %c0_i32 = arith.constant 0 : i32
    %c0_i32_0 = arith.constant 0 : i32
    %c0_i32_1 = arith.constant 0 : i32
    return %arg0, %c0_i32, %c0_i32_0 : i32, i32, i32
  }
}

</mosaic_0001>

<bundles_post_ra>
// kernel: tpu_custom_call.1
= control target key start
LH: loop header
LB: loop body
LE: loop exit
PB: predicated region body
PF: predicated region fallthrough
CT: control target
= control target key end

     0   :  { %s812_s26 = smov [#allocation5]   ;;  %s1015_s0 = inlined_call_operand.vmem [shape: s32[2], index: 0, kind: input, shape index: {}]   ;;  %s1016_s1 = inlined_call_operand.hbm [shape: f32[2,8,32], index: 1, kind: input, shape index: {}]   ;;  %s1017_s2 = inlined_call_operand.hbm [shape: f32[32,32], index: 2, kind: input, shape index: {}]   ;;  %s1018_s3 = inlined_call_operand.vmem [shape: f32[1,32], index: 3, kind: input, shape index: {}]   ;;  %s1019_s4 = inlined_call_operand.vmem [shape: f32[1,32], index: 4, kind: input, shape index: {}]   ;;  %s1020_s6 = inlined_call_operand.hbm [shape: f32[2,1,32], index: 6, kind: output, shape index: {}]   ;;  %s1021_s5 = inlined_call_operand.<no memory space> [shape: f32[1,1], index: 5, kind: input, shape index: {}]  }
   0x1   :  { %s12_s23 = sshll.u32 %s1015_s0, 4  ;;  %v16_v0 = vstv %s1021_s5  ;;  %s13_s23 = int_to_ptr.vmem [resolvable:$true] %s12_s23 }
   0x2   :  { %17 = vst [vmem:[#allocation6] sm:$0x1] %v16_v0  ;;  %15 = dma.vmem_to_smem %s13_s23, 16, %s812_s26, [#allocation4] }
   0x3   :  { %774 = dma.done.wait [#allocation4], 16 }
   0x4   :  { %775 = vsyncadd [#allocation4], 4294967280 }
   0x5   :  { %20 = sfence }
   0x6   :  { %21 = vsyncpa [#allocation8], 0 }
   0x7   :  { %23 = vsyncpa [#allocation8 + $0x1], 0 }
   0x8   :  { %24 = vsyncpa [#allocation11], 0 }
   0x9   :  { %25 = vsyncpa [#allocation9], 0 }
   0xa   :  { %27 = vsyncpa [#allocation9 + $0x1], 0  ;;  %s859_s27 = smov 0   ;;  %s861_s28 = smov 0  }
   0xb   :  { %s863_s0 = smov 0   ;;  %s865_s29 = smov 0  }
   0xc   :  { %s867_s5 = smov 0   ;;  %s869_s30 = smov 0  }
   0xd LB: > { %s547_s7 = sadd.s32 4294967295, %s810_s30   ;;  %p549_p0 = scmp.ge.s32.totalorder %s810_s30, 1  ;;  %s810_s30 = sphi %s869_s30, %s33_s30   ;;  %s806_s5 = sphi %s867_s5, %s1032_s5   ;;  %s802_s29 = sphi %s865_s29, %s1031_s29   ;;  %s798_s0 = sphi %s863_s0, %s1030_s0   ;;  %s794_s28 = sphi %s861_s28, %s1029_s28   ;;  %s790_s27 = sphi %s859_s27, %s1028_s27  }
   0xe   : > { %p891_p1 = scmp.eq.s32.totalorder %s547_s7, 0  ;;  %p188_p2 = scmp.lt.s32.totalorder %s810_s30, 3 }
   0xf   : > { %s199_s11 = sshll.u32 %s1017_s2, 4  ;;  %s813_s13 = smov [#allocation10]   ;;  %s200_s11 = int_to_ptr.hbm [resolvable:$true] %s199_s11 }
  0x10   : > { %p899_p3 = pnand %p549_p0, %p188_p2  ;;  %s201_s14 = sshll.u32 %s813_s13, 4  ;;  %s202_s14 = int_to_ptr.vmem [resolvable:$true] %s201_s14 }
  0x11   : > { %p551_p6 = scmp.ge.s32.totalorder %s810_s30, 2  ;;  %s814_s15 = smov 128  }
  0x12   : > { %p569_p4 = pneg %p899_p3  ;;  %s815_s16 = smov 8  }
  0x13   : > { %s548_s17 = sadd.s32 4294967294, %s810_s30   ;;  %s45_s18 = sadd.s32 1, %s806_s5 }
  0x14   : > { %p570_p5 = pnand %p569_p4, %p891_p1  ;;  %s54_s19 = sadd.s32 1, %s798_s0 }
  0x15   : > { %p47_p7 = scmp.ge.s32.totalorder %s45_s18, 2  ;;  %p61_p8 = scmp.ne.s32.totalorder %s798_s0, %s794_s28 }
  0x16   : > { %572 = dma.hbm_to_vmem [thread:$0]  (!%p570_p5), %s200_s11, 512, %s202_s14, [#allocation11], %s814_s15, %s814_s15, %s815_s16  }
  0x17   : > { %p62_p9 = scmp.eq.s32.totalorder %s810_s30, 0  ;;  %p67_p10 = scmp.ne.s32.totalorder %s794_s28, %s790_s27 }
  0x18   : > { %s1034_s18 = smov (%p47_p7, %s45_s18), 0  ;;  %p175_p13 = scmp.eq.s32.totalorder %s547_s7, 1 }
  0x19   : > { %p918_p11 = por %p62_p9, %p61_p8  ;;  %p924_p12 = por %p891_p1, %p67_p10 }
  0x1a   : > { %s49_s22 = ssub.s32 %s806_s5, %s1034_s18  ;;  %p181_p2 = scmp.eq.s32.totalorder %s548_s17, 1 }
  0x1b   : > { %p52_p0 = scmp.eq.s32.totalorder %s49_s22, 0  ;;  %p930_p4 = por %p175_p13, %p61_p8 }
  0x1c   : > { %p582_p5 = scmp.lt.s32.totalorder %s810_s30, 2  ;;  %p938_p7 = por %p181_p2, %p67_p10 }
  0x1d   : > { %s936_s24 = scalar_select %p52_p0, %s798_s0, %s54_s19  }
  0x1e   : > { %s224_s26 = sand.u32 1, %s798_s0   ;;  %s553_s10 = sshll.u32 %s806_s5, 3 }
  0x1f   : > { %s552_s9 = sshll.u32 %s224_s26, 3  ;;  %s233_s7 = scalar_lea.hbm %s1016_s1, %s553_s10 }
  0x20   : > { %s228_s14 = scalar_lea.vmem [#allocation7], %s552_s9  ;;  %s235_s16 = sshll.u32 %s233_s7, 4  ;;  %s236_s16 = int_to_ptr.hbm [resolvable:$true] %s235_s16 }
  0x21   : > { %s237_s15 = sshll.u32 %s228_s14, 4  ;;  %p574_p8 = pnand %p582_p5, %p918_p11  ;;  %s238_s15 = int_to_ptr.vmem [resolvable:$true] %s237_s15 }
  0x22   : > { %s225_s17 = scalar_lea.sflag [#allocation8], %s224_s26  ;;  %246 = sbr.rel (%p899_p3) target bundleno = 622 (0x26e), region = 40 }
  0x23   : > { %576 = dma.hbm_to_vmem [thread:$0]  (!%p574_p8), %s236_s16, 128, %s238_s15, %s225_s17  }
  0x24   : > { %s952_s19 = sand.u32 (!%p899_p3), 1, %s794_s28  }
  0x25   : > { %s555_s22 = sshll.u32 (!%p899_p3), %s952_s19, 3  ;;  %s249_s10 = scalar_lea.sflag (!%p899_p3), [#allocation8], %s952_s19 }
  0x26   : > { %s252_s9 = scalar_lea.vmem (!%p899_p3), [#allocation7], %s555_s22 }
  0x27   : > { %777 = dma.done.wait (%p924_p12), %s249_s10, 128  }
  0x28   : > { %779 = vsyncadd (%p924_p12), %s249_s10, 4294967168 }
  0x29   : > { %781 = dma.done.wait (%p891_p1), [#allocation11], 512  }
  0x2a   : > { %783 = vsyncadd (%p891_p1), [#allocation11], 4294966784  ;;  %v296_v1 = vld [vmem:[#allocation10 + $0x18] sm:$0xff]  ;;  %v295_v2 = vld [vmem:[#allocation10 + $0x10] sm:$0xff]  ;;  %vm301_vm0 = vcmask 261120   ;;  %vm288_vm1 = vcmask 0   ;;  %v340_v18 = vlaneseq  ;;  %s458_s7 = scalar_lea.hbm %s1020_s6, %s802_s29 }
  0x2b   : > { %317 = vmatpush.msra.mxu0 %v296_v1  ;;  %v292_v3 = vld [vmem:[%s252_s9] sm:$0xff]  ;;  %v294_v4 = vld [vmem:[#allocation10 + $0x8] sm:$0xff]  ;;  %v293_v5 = vld [vmem:[#allocation10] sm:$0xff]  ;;  %v816_v13 = vmov 0.0   ;;  %v817_v15 = vmov 0   ;;  %s344_s26 = sld [smem:[#allocation5 + %s802_s29]] }
  0x2c   : > { %414 = vmatpush.msra.mxu1 %v292_v3  ;;  %v641_v6 = vld [vmem:[%s1018_s3] ss:$0 sm:$0xff]  ;;  %289 = vst.msk [vmem:[#allocation2] sm:$0x1] %vm288_vm1, %v816_v13  ;;  %v643_v14 = vld [vmem:[#allocation6] ss:$0 sm:$0xff]  ;;  %639 = vset.pattern.permute.xlu1 %v817_v15 }
  0x2d   : > { %318 = vmatpush.msra.mxu0 %v295_v2  ;;  %v642_v9 = vld [vmem:[%s1019_s4] ss:$0 sm:$0xff]  ;;  %v341_v20 = vshrl.u32 %v340_v18, 7  ;;  %vm351_vm3 = vcmask 7168   ;;  %vm290_vm4 = vcmask 253952   ;;  %vm395_vm5 = vcmask 64512  }
  0x2e   : > { %291 = vst.msk [vmem:[#allocation3] sm:$0x1] %vm290_vm4, %v816_v13  ;;  %s283_s14 = scalar_lea.vmem [#allocation12], %s952_s19  ;;  %s462_s16 = sshll.u32 %s458_s7, 4  ;;  %s463_s16 = int_to_ptr.hbm [resolvable:$true] %s462_s16 }
  0x2f   : > { %319 = vmatpush.msra.mxu0 %v294_v4  ;;  %s460_s15 = sshll.u32 %s283_s14, 4  ;;  %s450_s17 = scalar_lea.sflag [#allocation9], %s952_s19  ;;  %s461_s15 = int_to_ptr.vmem [resolvable:$true] %s460_s15 }
  0x30   : > { %s736_s22 = sshra.s32 %s463_s16, 4  ;;  %s742_s12 = scalar_lea.hbm %s1020_s6, 2  ;;  %s737_s22 = int_to_ptr.hbm [resolvable:$true] %s736_s22 }
  0x31   : > { %320 = vmatpush.msra.mxu0 %v293_v5  ;;  %v345_v21 = vstv %s344_s26  ;;  %s738_s10 = scalar_lea.hbm %s737_s22, 1  ;;  %p743_p10 = scmp.lt.s32.totalorder %s737_s22, %s1020_s6 }
  0x32   : > { %557 = vmatmul.msk.f32.vlgmr.msra.gmra.mxu0 %vm301_vm0, %v292_v3  ;;  %vm346_vm2 = vcmp.lt.s32.totalorder %v341_v20, %v345_v21  ;;  %p739_p1 = scmp.ne.s32.totalorder %s737_s22, %s738_s10  ;;  %p744_p11 = scmp.lt.s32.totalorder %s742_s12, %s738_s10 }
  0x33   : > { %v350_v30 = vld [vmem:[#allocation2] sm:$0x1] }
  0x34   : > { %p740_p3 = pnand %p739_p1, %p930_p4  ;;  %p745_p12 = por %p744_p11, %p743_p10 }
  0x35   : > { %v362_v40 = vld [vmem:[#allocation3] sm:$0x1] }
  0x36   : > { %p741_p9 = pneg %p740_p3 }
  0x38   : > { %p746_p13 = pnand %p745_p12, %p741_p9 }
  0xaf   : > { %v322_v7 = vpop.f32.mrf.mxu0 }
  0xb0   : > { %v323_v8 = vadd.f32 %v641_v6, %v322_v7 }
  0xb2   : > { %644 = vtanh.f32 %v323_v8 }
  0xb8   : > { %v645_v10 = vpop.eup %644 }
  0xb9   : > { %v330_v11 = vmul.f32 %v645_v10, %v642_v9 }
  0xbb   : > { %v331_v12 = vsel %vm301_vm0, %v330_v11, 0.0 }
  0xbc   : > { %332 = vadd.xlane.f32.xlu0 %v331_v12 }
 0x12f   : > { %v333_v16 = vpop.xlane.xlu0 %332 }
 0x130   : > { %v338_v17 = vadd.f32 %v643_v14, %v333_v16 }
 0x132   : > { %v347_v19 = vmul.f32 1.442695, %v338_v17 }
 0x134   : > { %646 = vpow2.f32 %v347_v19 }
 0x13a   : > { %v647_v22 = vpop.eup %646 }
 0x13b   : > { %v349_v23 = vsel %vm346_vm2, %v647_v22, 0.0 }
 0x13c   : > { %363 = vxpose.xlu0.b32.start.end [1/1] (short) (narrow) %v349_v23, 8  ;;  %v352_v24 = vsel %vm351_vm3, %v349_v23, 0.0 }
 0x13d   : > { %v353_v25 = vrot.slane %v352_v24, 4 }
 0x13f   : > { %v354_v26 = vadd.f32 %v353_v25, %v352_v24 }
 0x141   : > { %v355_v27 = vrot.slane %v354_v26, 2 }
 0x143   : > { %v356_v28 = vadd.f32 %v355_v27, %v354_v26 }
 0x145   : > { %v357_v29 = vrot.slane %v356_v28, 1 }
 0x147   : > { %v358_v31 = vadd.f32 %v357_v29, %v356_v28 }
 0x149   : > { %v359_v32 = vadd.f32 %v358_v31, %v350_v30 }
 0x14b   : > { %361 = vst.msk [vmem:[#allocation2] sm:$0x1] %vm288_vm1, %v359_v32 }
 0x152   : > { %v426_v33 = vld [vmem:[#allocation2] sm:$0x1] }
 0x153   : > { %429 = vperm.xlu1 %639, %v426_v33  }
 0x1a3   : > { %640 = vset.pattern.permute.xlu0 %v817_v15 }
 0x1c5   : > { %v430_v35 = vpop.permute.xlu1 %429 }
 0x1c6   : > { %v432_v36 = vperm.slane %v430_v35, 0 }
 0x1c8   : > { %648 = vrcp.f32 %v432_v36  ;;  %v444_v45 = vand.u32 2147483648, %v432_v36  ;;  %vm438_vm7 = vweird.f32 %v432_v36  ;;  %v442_v46 = vand.u32 2147483647, %v432_v36 }
 0x1ca   : > { %v445_v48 = vor.u32 1.1754944e-38, %v444_v45  ;;  %vm443_vm9 = vcmp.eq.f32.partialorder %v442_v46, 8.507059e+37 }
 0x1ce   : > { %v649_v37 = vpop.eup %648 }
 0x1cf   : > { %v434_v38 = vmul.f32 %v649_v37, %v432_v36  ;;  %vm439_vm6 = vweird.f32 %v649_v37 }
 0x1d0   : > { %vm440_vm8 = vmor %vm438_vm7, %vm439_vm6 }
 0x1d1   : > { %v435_v39 = vsub.f32 1.0, %v434_v38 }
 0x1d3   : > { %v436_v41 = vmul.f32 %v649_v37, %v435_v39 }
 0x1d5   : > { %v437_v44 = vadd.f32 %v649_v37, %v436_v41 }
 0x1d7   : > { %v441_v47 = vsel %vm440_vm8, %v649_v37, %v437_v44 }
 0x1d8   : > { %v446_v50 = vsel %vm443_vm9, %v445_v48, %v441_v47 }
 0x1e0   : > { %v379_v34 = vpop.trf.xlu0 }
 0x1e1   : > { %558 = vmatmul.msk.f32.vlgmr.msra.gmra.mxu1 %vm395_vm5, %v379_v34 }
 0x25e   : > { %v416_v42 = vpop.f32.mrf.mxu1 }
 0x25f   : > { %v419_v43 = vadd.f32 %v416_v42, %v362_v40 }
 0x261   : > { %421 = vst.msk [vmem:[#allocation3] sm:$0x1] %vm290_vm4, %v419_v43 }
 0x268   : > { %v425_v49 = vld [vmem:[#allocation3] sm:$0x1] }
 0x269   : > { %v447_v51 = vmul.f32 %v446_v50, %v425_v49 }
 0x26b   : > { %448 = vst.msk [vmem:[%s283_s14] sm:$0x1] %vm290_vm4, %v447_v51 }
 0x26c   : > { %749 = shalt.err (!%p746_p13)
}
 0x26d   : > { %567 = dma.vmem_to_hbm [thread:$0]  (%p930_p4), %s461_s15, 16, %s463_s16, %s450_s17  }
 0x26e PF: > { %s474_s19 = sand.u32 1, %s790_s27   ;;  %p578_p0 = pnand %p551_p6, %p938_p7 }
 0x26f   : > { %s475_s21 = scalar_lea.sflag [#allocation9], %s474_s19 }
 0x270   : > { %p579_p2 = pneg %p578_p0 }
 0x272   : > { %785 = dma.done.wait (%p579_p2), %s475_s21, 16  }
 0x273   : > { %787 = vsyncadd (%p579_p2), %s475_s21, 4294967280  ;;  %s33_s30 = sadd.s32 1, %s810_s30   ;;  %s1028_s27 = smov %s794_s28 }
 0x274   : > { %p30_p5 = scmp.ge.s32.totalorder %s33_s30, 4   ;;  %s1029_s28 = smov %s798_s0 }
 0x275   : > { %s1030_s0 = smov %s936_s24  ;;  %s1031_s29 = smov %s806_s5 }
 0x276   : > { %s1032_s5 = smov %s1034_s18  ;;  %32 = sbr.rel (!%p30_p5) target bundleno = 13 (0xd), region = 97 }
 0x27b   :  { %480 = vsyncpa [#allocation8], 1 }
 0x27c   :  { %482 = vsyncpa [#allocation8 + $0x1], 1 }
 0x27d   :  { %483 = vsyncpa [#allocation11], 1 }
 0x27e   :  { %484 = vsyncpa [#allocation9], 1 }
 0x27f   :  { %486 = vsyncpa [#allocation9 + $0x1], 1 }

</bundles_post_ra>
